<compile_context>
chip_gen: v6e
topology: v6e:2x2x1
jax: 0.10.0
libtpu: 0.0.40
codegen_flags: <defaults>
</compile_context>

<pallas_src>
import math
import functools

import jax
import jax.numpy as jnp
from jax.experimental import pallas as pl
from jax.experimental.pallas import tpu as pltpu

LN_EPS = 1e-5


def _layer_norm(x, gamma, beta):
    # f32 VPU math; rsqrt goes to the EUP.
    mu = jnp.mean(x, axis=-1, keepdims=True)
    var = jnp.mean((x - mu) ** 2, axis=-1, keepdims=True)
    return (x - mu) * jax.lax.rsqrt(var + LN_EPS) * gamma + beta


def encoder_layer_kernel(
    x_q_ref,                      # (TQ, D) f32  query / residual tile
    x_kv_ref,                     # (S,  D) bf16 full row (used only at qi==0)
    wq_ref, bq_ref,               # (D, D) bf16 (1/sqrt(hd) folded), (1, D) f32
    wkv_ref, bkv_ref,             # (D, 2D) bf16 (K|V fused), (1, 2D) f32
    wo_ref, bo_ref,               # (D, D) bf16, (1, D) f32
    g1_ref, be1_ref,              # (1, D) f32
    w1_ref, b1_ref,               # (D, F) bf16, (1, F) f32
    w2_ref, b2_ref,               # (F, D) bf16, (1, D) f32
    g2_ref, be2_ref,              # (1, D) f32
    o_ref,                        # (TQ, D)
    k_scratch, v_scratch,         # (S, D) bf16 VMEM, persist across qi
    oh_scratch,                   # (TQ, D) f32 VMEM, concatenated head outputs
    *, nhead,
):
    TQ, D = x_q_ref.shape
    S = x_kv_ref.shape[0]
    hd = D // nhead

    # --- K/V projection: once per batch row, result kept bf16 in scratch ---
    @pl.when(pl.program_id(1) == 0)
    def _():
        kv = jnp.dot(x_kv_ref[...], wkv_ref[...],
                     preferred_element_type=jnp.float32)          # (S, 2D) f32
        k_scratch[...] = (kv[:, :D] + bkv_ref[:, :D]).astype(jnp.bfloat16)
        v_scratch[...] = (kv[:, D:] + bkv_ref[:, D:]).astype(jnp.bfloat16)

    x_q = x_q_ref[...]                                            # (TQ, D) f32

    # --- Q projection (scale folded into wq/bq at pack time) ---
    q = jnp.dot(x_q.astype(jnp.bfloat16), wq_ref[...],
                preferred_element_type=jnp.float32) + bq_ref[...]
    q_b = q.astype(jnp.bfloat16)
    k_b = k_scratch[...]                                          # (S, D) bf16
    v_b = v_scratch[...]                                          # (S, D) bf16

    # --- Multi-head attention: per-head scores + softmax; each head's output
    #     lands in its column slab, then ONE fused (TQ,D)@(D,D) out-proj ---
    for h in range(nhead):
        qh = q_b[:, h * hd:(h + 1) * hd]          # (TQ, hd)
        kh = k_b[:, h * hd:(h + 1) * hd]          # (S,  hd)
        vh = v_b[:, h * hd:(h + 1) * hd]          # (S,  hd)
        # q @ k^T with the transpose folded into the MXU (no XLU transpose).
        s = jax.lax.dot_general(qh, kh, (((1,), (1,)), ((), ())),
                                preferred_element_type=jnp.float32)  # (TQ, S)
        s = s - jnp.max(s, axis=-1, keepdims=True)
        p = jnp.exp(s)                                               # f32
        inv = pl.reciprocal(jnp.sum(p, axis=-1, keepdims=True), approx=True)
        p = p * inv
        oh = jnp.dot(p.astype(jnp.bfloat16), vh,
                     preferred_element_type=jnp.float32)             # (TQ, hd)
        oh_scratch[:, h * hd:(h + 1) * hd] = oh

    attn = jnp.dot(oh_scratch[...].astype(jnp.bfloat16), wo_ref[...],
                   preferred_element_type=jnp.float32) + bo_ref[...]

    # --- Residual + LayerNorm 1 (post-norm), f32 ---
    y = _layer_norm(x_q + attn, g1_ref[...], be1_ref[...])

    # --- Feed-forward (ReLU), bf16 MXU operands, f32 elementwise ---
    h1 = jnp.dot(y.astype(jnp.bfloat16), w1_ref[...],
                 preferred_element_type=jnp.float32) + b1_ref[...]
    h1 = jnp.maximum(h1, 0.0)
    ff = jnp.dot(h1.astype(jnp.bfloat16), w2_ref[...],
                 preferred_element_type=jnp.float32) + b2_ref[...]

    # --- Residual + LayerNorm 2 ---
    z = _layer_norm(y + ff, g2_ref[...], be2_ref[...])
    o_ref[...] = z.astype(o_ref.dtype)


def run_encoder_layer(x, kp, nhead, tq=None,
                      vmem_limit_bytes=64 * 1024 * 1024):
    # vmem_limit_bytes: 64 MiB is safe on every chip (v7x has 64 MiB/TC); on
    # v5e/v6e it can be raised toward ~100 MiB for larger tiles.
    B, S, D = x.shape
    if tq is None:
        tq = S if S <= 128 else 128
    assert S % tq == 0, "S must be divisible by the query tile"
    n_q = S // tq

    x_kv = x.astype(jnp.bfloat16)   # bf16 K/V operand (halves resident row)

    names = ("wq", "bq", "wkv", "bkv", "wo", "bo",
             "g1", "be1", "w1", "b1", "w2", "b2", "g2", "be2")
    params = [kp[n] for n in names]

    # Grid-invariant weights/biases: whole array resident in VMEM, single copy
    # (no pipelining, no double buffer).
    weight_spec = pl.BlockSpec(memory_space=pltpu.MemorySpace.VMEM)

    in_specs = (
        [pl.BlockSpec((None, tq, D), lambda b, qi: (b, qi, 0)),   # Q/residual tile
         pl.BlockSpec((None, S, D), lambda b, qi: (b, 0, 0))]     # full row (K/V)
        + [weight_spec] * len(params)
    )
    out_specs = pl.BlockSpec((None, tq, D), lambda b, qi: (b, qi, 0))

    kernel = functools.partial(encoder_layer_kernel, nhead=nhead)

    return pl.pallas_call(
        kernel,
        out_shape=jax.ShapeDtypeStruct((B, S, D), x.dtype),
        grid=(B, n_q),
        in_specs=in_specs,
        out_specs=out_specs,
        scratch_shapes=[
            pltpu.VMEM((S, D), jnp.bfloat16),   # K for current batch row
            pltpu.VMEM((S, D), jnp.bfloat16),   # V for current batch row
            pltpu.VMEM((tq, D), jnp.float32),   # concatenated head outputs
        ],
        compiler_params=pltpu.CompilerParams(
            # batch axis parallel (megacore); query-tile axis "arbitrary" so
            # the K/V scratch computed at qi==0 stays valid across the row.
            dimension_semantics=("parallel", "arbitrary"),
            vmem_limit_bytes=vmem_limit_bytes,
        ),
    )(x, x_kv, *params)


def init_layer_params(key, d_model, dim_feedforward):
    """f32 parameters in PyTorch layout: weights stored as (in_dim, out_dim)."""
    ks = jax.random.split(key, 6)
    std = 0.02
    D, F = d_model, dim_feedforward
    return {
        "wq": jax.random.normal(ks[0], (D, D), jnp.float32) * std,
        "wk": jax.random.normal(ks[1], (D, D), jnp.float32) * std,
        "wv": jax.random.normal(ks[2], (D, D), jnp.float32) * std,
        "bq": jnp.zeros((1, D), jnp.float32),
        "bk": jnp.zeros((1, D), jnp.float32),
        "bv": jnp.zeros((1, D), jnp.float32),
        "wo": jax.random.normal(ks[3], (D, D), jnp.float32) * std,
        "bo": jnp.zeros((1, D), jnp.float32),
        "g1": jnp.ones((1, D), jnp.float32),
        "be1": jnp.zeros((1, D), jnp.float32),
        "g2": jnp.ones((1, D), jnp.float32),
        "be2": jnp.zeros((1, D), jnp.float32),
        "w1": jax.random.normal(ks[4], (D, F), jnp.float32) * std,
        "b1": jnp.zeros((1, F), jnp.float32),
        "w2": jax.random.normal(ks[5], (F, D), jnp.float32) * std,
        "b2": jnp.zeros((1, D), jnp.float32),
    }


def pack_layer_params(p, nhead):
    """Kernel-ready params: fused K|V weight, bf16 matmul weights, and the
    1/sqrt(head_dim) softmax scale folded into the Q projection."""
    D = p["wq"].shape[0]
    hd = D // nhead
    scale = 1.0 / math.sqrt(hd)
    return {
        "wq": (p["wq"] * scale).astype(jnp.bfloat16),
        "bq": p["bq"] * scale,
        "wkv": jnp.concatenate([p["wk"], p["wv"]], axis=1).astype(jnp.bfloat16),
        "bkv": jnp.concatenate([p["bk"], p["bv"]], axis=1),
        "wo": p["wo"].astype(jnp.bfloat16),
        "bo": p["bo"],
        "g1": p["g1"], "be1": p["be1"],
        "w1": p["w1"].astype(jnp.bfloat16), "b1": p["b1"],
        "w2": p["w2"].astype(jnp.bfloat16), "b2": p["b2"],
        "g2": p["g2"], "be2": p["be2"],
    }


def pack_encoder_params(layer_params, nhead):
    """Pack / cast once (not per forward)."""
    return [pack_layer_params(p, nhead) for p in layer_params]


def transformer_encoder(x, packed_params, nhead):
    for kp in packed_params:
        x = run_encoder_layer(x, kp, nhead)
    return x


# ---------------- pure-JAX f32 reference (for correctness check) ----------------
def ref_layer(x, p, nhead):
    B, S, D = x.shape
    hd = D // nhead
    q = x @ p["wq"] + p["bq"]
    k = x @ p["wk"] + p["bk"]
    v = x @ p["wv"] + p["bv"]

    def split(t):
        return t.reshape(B, S, nhead, hd).transpose(0, 2, 1, 3)

    qh, kh, vh = split(q), split(k), split(v)
    s = jnp.einsum("bhqd,bhkd->bhqk", qh, kh) / math.sqrt(hd)
    a = jax.nn.softmax(s, axis=-1)
    o = jnp.einsum("bhqk,bhkd->bhqd", a, vh)
    o = o.transpose(0, 2, 1, 3).reshape(B, S, D)
    attn = o @ p["wo"] + p["bo"]

    def ln(t, g, b):
        mu = t.mean(-1, keepdims=True)
        var = ((t - mu) ** 2).mean(-1, keepdims=True)
        return (t - mu) * jax.lax.rsqrt(var + LN_EPS) * g + b

    y = ln(x + attn, p["g1"], p["be1"])
    ff = jax.nn.relu(y @ p["w1"] + p["b1"]) @ p["w2"] + p["b2"]
    return ln(y + ff, p["g2"], p["be2"])


def ref_encoder(x, layer_params, nhead):
    for p in layer_params:
        x = ref_layer(x, p, nhead)
    return x


if __name__ == "__main__":
    d_model, nhead, num_layers, dim_feedforward = 32, 4, 2, 64
    B, S = 2, 8

    key = jax.random.PRNGKey(0)
    kx, *klayers = jax.random.split(key, 1 + num_layers)
    x = jax.random.normal(kx, (B, S, d_model), jnp.float32)
    layer_params = [init_layer_params(k, d_model, dim_feedforward)
                    for k in klayers]

    packed = pack_encoder_params(layer_params, nhead)   # pack/cast once
    out = transformer_encoder(x, packed, nhead)
    out = jax.block_until_ready(out)

    ref = jax.block_until_ready(ref_encoder(x, layer_params, nhead))
    assert out.shape == (B, S, d_model)
    # Kernel uses bf16 MXU operands + approx EUP reciprocal; compare against
    # the f32 reference with a tolerance sized for bf16 matmul rounding.
    assert jnp.allclose(out, ref, atol=5e-2, rtol=5e-2), "mismatch vs reference"

    print("KERNEL_OK")
</pallas_src>

<mosaic_0001>
module attributes {stable_mosaic.version = 11 : i64} {
  func.func @encoder_layer_kernel(%arg0: i32, %arg1: i32, %arg2: memref<1x8x32xf32, #tpu.memory_space<vmem>>, %arg3: memref<1x8x32xbf16, #tpu.memory_space<vmem>>, %arg4: memref<32x32xbf16, #tpu.memory_space<vmem>>, %arg5: memref<1x32xf32, #tpu.memory_space<vmem>>, %arg6: memref<32x64xbf16, #tpu.memory_space<vmem>>, %arg7: memref<1x64xf32, #tpu.memory_space<vmem>>, %arg8: memref<32x32xbf16, #tpu.memory_space<vmem>>, %arg9: memref<1x32xf32, #tpu.memory_space<vmem>>, %arg10: memref<1x32xf32, #tpu.memory_space<vmem>>, %arg11: memref<1x32xf32, #tpu.memory_space<vmem>>, %arg12: memref<32x64xbf16, #tpu.memory_space<vmem>>, %arg13: memref<1x64xf32, #tpu.memory_space<vmem>>, %arg14: memref<64x32xbf16, #tpu.memory_space<vmem>>, %arg15: memref<1x32xf32, #tpu.memory_space<vmem>>, %arg16: memref<1x32xf32, #tpu.memory_space<vmem>>, %arg17: memref<1x32xf32, #tpu.memory_space<vmem>>, %arg18: memref<1x8x32xf32, #tpu.memory_space<vmem>>, %arg19: memref<8x32xbf16, #tpu.memory_space<vmem>>, %arg20: memref<8x32xbf16, #tpu.memory_space<vmem>>, %arg21: memref<8x32xf32, #tpu.memory_space<vmem>>) attributes {dimension_semantics = [#tpu.dimension_semantics<parallel>, #tpu.dimension_semantics<arbitrary>], iteration_bounds = array<i64: 2, 1>, scalar_prefetch = 0 : i64, scratch_operands = 3 : i64, tpu.core_type = #tpu.core_type<tc>, window_params = [{transform_indices = @transform_0, window_bounds = array<i64: 1, 8, 32>}, {transform_indices = @transform_1, window_bounds = array<i64: 1, 8, 32>}, {pipeline_mode = #tpu.pipeline_mode<synchronous>, transform_indices = @transform_2, window_bounds = array<i64: 32, 32>}, {pipeline_mode = #tpu.pipeline_mode<synchronous>, transform_indices = @transform_3, window_bounds = array<i64: 1, 32>}, {pipeline_mode = #tpu.pipeline_mode<synchronous>, transform_indices = @transform_4, window_bounds = array<i64: 32, 64>}, {pipeline_mode = #tpu.pipeline_mode<synchronous>, transform_indices = @transform_5, window_bounds = array<i64: 1, 64>}, {pipeline_mode = #tpu.pipeline_mode<synchronous>, transform_indices = @transform_6, window_bounds = array<i64: 32, 32>}, {pipeline_mode = #tpu.pipeline_mode<synchronous>, transform_indices = @transform_7, window_bounds = array<i64: 1, 32>}, {pipeline_mode = #tpu.pipeline_mode<synchronous>, transform_indices = @transform_8, window_bounds = array<i64: 1, 32>}, {pipeline_mode = #tpu.pipeline_mode<synchronous>, transform_indices = @transform_9, window_bounds = array<i64: 1, 32>}, {pipeline_mode = #tpu.pipeline_mode<synchronous>, transform_indices = @transform_10, window_bounds = array<i64: 32, 64>}, {pipeline_mode = #tpu.pipeline_mode<synchronous>, transform_indices = @transform_11, window_bounds = array<i64: 1, 64>}, {pipeline_mode = #tpu.pipeline_mode<synchronous>, transform_indices = @transform_12, window_bounds = array<i64: 64, 32>}, {pipeline_mode = #tpu.pipeline_mode<synchronous>, transform_indices = @transform_13, window_bounds = array<i64: 1, 32>}, {pipeline_mode = #tpu.pipeline_mode<synchronous>, transform_indices = @transform_14, window_bounds = array<i64: 1, 32>}, {pipeline_mode = #tpu.pipeline_mode<synchronous>, transform_indices = @transform_15, window_bounds = array<i64: 1, 32>}, {transform_indices = @transform_16, window_bounds = array<i64: 1, 8, 32>}]} {
    %c0_i32 = arith.constant 0 : i32
    %0 = arith.cmpi eq, %arg1, %c0_i32 : i32
    %1 = arith.extui %0 : i1 to i32
    %c0_i32_0 = arith.constant 0 : i32
    %2 = arith.cmpi ne, %1, %c0_i32_0 : i32
    scf.if %2 {
      %c0_71 = arith.constant 0 : index
      %c0_72 = arith.constant 0 : index
      %c0_73 = arith.constant 0 : index
      %156 = vector.load %arg3[%c0_71, %c0_72, %c0_73] : memref<1x8x32xbf16, #tpu.memory_space<vmem>>, vector<1x8x32xbf16>
      %157 = vector.shape_cast %156 : vector<1x8x32xbf16> to vector<8x32xbf16>
      %c0_74 = arith.constant 0 : index
      %c0_75 = arith.constant 0 : index
      %158 = vector.load %arg6[%c0_74, %c0_75] : memref<32x64xbf16, #tpu.memory_space<vmem>>, vector<32x64xbf16>
      %cst_76 = arith.constant dense<0.000000e+00> : vector<8x64xf32>
      %159 = tpu.matmul %157, %158, %cst_76 {dimension_numbers = #tpu.dot_dimension_numbers<[1], [0], [0], [1], [0, 0, 1, 1], [], []>} : vector<8x32xbf16>, vector<32x64xbf16>, vector<8x64xf32> -> vector<8x64xf32>
      %160 = vector.extract_strided_slice %159 {offsets = [0, 0], sizes = [8, 32], strides = [1, 1]} : vector<8x64xf32> to vector<8x32xf32>
      %c0_77 = arith.constant 0 : index
      %c0_78 = arith.constant 0 : index
      %161 = vector.load %arg7[%c0_77, %c0_78] : memref<1x64xf32, #tpu.memory_space<vmem>>, vector<1x32xf32>
      %162 = vector.broadcast %161 : vector<1x32xf32> to vector<8x32xf32>
      %163 = arith.addf %160, %162 : vector<8x32xf32>
      %164 = arith.truncf %163 : vector<8x32xf32> to vector<8x32xbf16>
      %c0_79 = arith.constant 0 : index
      %c0_80 = arith.constant 0 : index
      %165 = vector.load %arg19[%c0_79, %c0_80] : memref<8x32xbf16, #tpu.memory_space<vmem>>, vector<8x32xbf16>
      tpu.vector_store %arg19[%c0_79, %c0_80], %164 {strides = array<i32>} : memref<8x32xbf16, #tpu.memory_space<vmem>>, vector<8x32xbf16>,
      %166 = vector.extract_strided_slice %159 {offsets = [0, 32], sizes = [8, 32], strides = [1, 1]} : vector<8x64xf32> to vector<8x32xf32>
      %c0_81 = arith.constant 0 : index
      %c32 = arith.constant 32 : index
      %167 = vector.load %arg7[%c0_81, %c32] : memref<1x64xf32, #tpu.memory_space<vmem>>, vector<1x32xf32>
      %168 = vector.broadcast %167 : vector<1x32xf32> to vector<8x32xf32>
      %169 = arith.addf %166, %168 : vector<8x32xf32>
      %170 = arith.truncf %169 : vector<8x32xf32> to vector<8x32xbf16>
      %c0_82 = arith.constant 0 : index
      %c0_83 = arith.constant 0 : index
      %171 = vector.load %arg20[%c0_82, %c0_83] : memref<8x32xbf16, #tpu.memory_space<vmem>>, vector<8x32xbf16>
      tpu.vector_store %arg20[%c0_82, %c0_83], %170 {strides = array<i32>} : memref<8x32xbf16, #tpu.memory_space<vmem>>, vector<8x32xbf16>,
    } else {
    }
    %c0 = arith.constant 0 : index
    %c0_1 = arith.constant 0 : index
    %c0_2 = arith.constant 0 : index
    %3 = vector.load %arg2[%c0, %c0_1, %c0_2] : memref<1x8x32xf32, #tpu.memory_space<vmem>>, vector<1x8x32xf32>
    %4 = vector.shape_cast %3 : vector<1x8x32xf32> to vector<8x32xf32>
    %5 = arith.truncf %4 : vector<8x32xf32> to vector<8x32xbf16>
    %c0_3 = arith.constant 0 : index
    %c0_4 = arith.constant 0 : index
    %6 = vector.load %arg4[%c0_3, %c0_4] : memref<32x32xbf16, #tpu.memory_space<vmem>>, vector<32x32xbf16>
    %cst = arith.constant dense<0.000000e+00> : vector<8x32xf32>
    %7 = tpu.matmul %5, %6, %cst {dimension_numbers = #tpu.dot_dimension_numbers<[1], [0], [0], [1], [0, 0, 1, 1], [], []>} : vector<8x32xbf16>, vector<32x32xbf16>, vector<8x32xf32> -> vector<8x32xf32>
    %c0_5 = arith.constant 0 : index
    %c0_6 = arith.constant 0 : index
    %8 = vector.load %arg5[%c0_5, %c0_6] : memref<1x32xf32, #tpu.memory_space<vmem>>, vector<1x32xf32>
    %9 = vector.broadcast %8 : vector<1x32xf32> to vector<8x32xf32>
    %10 = arith.addf %7, %9 : vector<8x32xf32>
    %11 = arith.truncf %10 : vector<8x32xf32> to vector<8x32xbf16>
    %c0_7 = arith.constant 0 : index
    %c0_8 = arith.constant 0 : index
    %12 = vector.load %arg19[%c0_7, %c0_8] : memref<8x32xbf16, #tpu.memory_space<vmem>>, vector<8x32xbf16>
    %c0_9 = arith.constant 0 : index
    %c0_10 = arith.constant 0 : index
    %13 = vector.load %arg20[%c0_9, %c0_10] : memref<8x32xbf16, #tpu.memory_space<vmem>>, vector<8x32xbf16>
    %14 = vector.extract_strided_slice %11 {offsets = [0, 0], sizes = [8, 8], strides = [1, 1]} : vector<8x32xbf16> to vector<8x8xbf16>
    %15 = vector.extract_strided_slice %12 {offsets = [0, 0], sizes = [8, 8], strides = [1, 1]} : vector<8x32xbf16> to vector<8x8xbf16>
    %16 = vector.extract_strided_slice %13 {offsets = [0, 0], sizes = [8, 8], strides = [1, 1]} : vector<8x32xbf16> to vector<8x8xbf16>
    %cst_11 = arith.constant dense<0.000000e+00> : vector<8x8xf32>
    %17 = tpu.matmul %14, %15, %cst_11 {dimension_numbers = #tpu.dot_dimension_numbers<[1], [1], [0], [0], [0, 0, 1, 0], [], []>} : vector<8x8xbf16>, vector<8x8xbf16>, vector<8x8xf32> -> vector<8x8xf32>
    %cst_12 = arith.constant dense<0xFF800000> : vector<8xf32>
    %18 = vector.multi_reduction <maximumf>, %17, %cst_12 [1] : vector<8x8xf32> to vector<8xf32>
    %19 = vector.shape_cast %18 : vector<8xf32> to vector<8x1xf32>
    %20 = vector.broadcast %19 : vector<8x1xf32> to vector<8x8xf32>
    %21 = arith.subf %17, %20 : vector<8x8xf32>
    %22 = math.exp %21 : vector<8x8xf32>
    %cst_13 = arith.constant dense<0.000000e+00> : vector<8xf32>
    %23 = vector.multi_reduction <add>, %22, %cst_13 [1] : vector<8x8xf32> to vector<8xf32>
    %24 = vector.shape_cast %23 : vector<8xf32> to vector<8x1xf32>
    %25 = tpu.reciprocal %24 {approx = true} : vector<8x1xf32> -> vector<8x1xf32>
    %26 = vector.broadcast %25 : vector<8x1xf32> to vector<8x8xf32>
    %27 = arith.mulf %22, %26 : vector<8x8xf32>
    %28 = arith.truncf %27 : vector<8x8xf32> to vector<8x8xbf16>
    %cst_14 = arith.constant dense<0.000000e+00> : vector<8x8xf32>
    %29 = tpu.matmul %28, %16, %cst_14 {dimension_numbers = #tpu.dot_dimension_numbers<[1], [0], [0], [1], [0, 0, 1, 1], [], []>} : vector<8x8xbf16>, vector<8x8xbf16>, vector<8x8xf32> -> vector<8x8xf32>
    %c0_15 = arith.constant 0 : index
    %c0_16 = arith.constant 0 : index
    %30 = vector.load %arg21[%c0_15, %c0_16] : memref<8x32xf32, #tpu.memory_space<vmem>>, vector<8x8xf32>
    tpu.vector_store %arg21[%c0_15, %c0_16], %29 {strides = array<i32>} : memref<8x32xf32, #tpu.memory_space<vmem>>, vector<8x8xf32>,
    %31 = vector.extract_strided_slice %11 {offsets = [0, 8], sizes = [8, 8], strides = [1, 1]} : vector<8x32xbf16> to vector<8x8xbf16>
    %32 = vector.extract_strided_slice %12 {offsets = [0, 8], sizes = [8, 8], strides = [1, 1]} : vector<8x32xbf16> to vector<8x8xbf16>
    %33 = vector.extract_strided_slice %13 {offsets = [0, 8], sizes = [8, 8], strides = [1, 1]} : vector<8x32xbf16> to vector<8x8xbf16>
    %cst_17 = arith.constant dense<0.000000e+00> : vector<8x8xf32>
    %34 = tpu.matmul %31, %32, %cst_17 {dimension_numbers = #tpu.dot_dimension_numbers<[1], [1], [0], [0], [0, 0, 1, 0], [], []>} : vector<8x8xbf16>, vector<8x8xbf16>, vector<8x8xf32> -> vector<8x8xf32>
    %cst_18 = arith.constant dense<0xFF800000> : vector<8xf32>
    %35 = vector.multi_reduction <maximumf>, %34, %cst_18 [1] : vector<8x8xf32> to vector<8xf32>
    %36 = vector.shape_cast %35 : vector<8xf32> to vector<8x1xf32>
    %37 = vector.broadcast %36 : vector<8x1xf32> to vector<8x8xf32>
    %38 = arith.subf %34, %37 : vector<8x8xf32>
    %39 = math.exp %38 : vector<8x8xf32>
    %cst_19 = arith.constant dense<0.000000e+00> : vector<8xf32>
    %40 = vector.multi_reduction <add>, %39, %cst_19 [1] : vector<8x8xf32> to vector<8xf32>
    %41 = vector.shape_cast %40 : vector<8xf32> to vector<8x1xf32>
    %42 = tpu.reciprocal %41 {approx = true} : vector<8x1xf32> -> vector<8x1xf32>
    %43 = vector.broadcast %42 : vector<8x1xf32> to vector<8x8xf32>
    %44 = arith.mulf %39, %43 : vector<8x8xf32>
    %45 = arith.truncf %44 : vector<8x8xf32> to vector<8x8xbf16>
    %cst_20 = arith.constant dense<0.000000e+00> : vector<8x8xf32>
    %46 = tpu.matmul %45, %33, %cst_20 {dimension_numbers = #tpu.dot_dimension_numbers<[1], [0], [0], [1], [0, 0, 1, 1], [], []>} : vector<8x8xbf16>, vector<8x8xbf16>, vector<8x8xf32> -> vector<8x8xf32>
    %c0_21 = arith.constant 0 : index
    %c8 = arith.constant 8 : index
    %47 = vector.load %arg21[%c0_21, %c8] : memref<8x32xf32, #tpu.memory_space<vmem>>, vector<8x8xf32>
    tpu.vector_store %arg21[%c0_21, %c8], %46 {strides = array<i32>} : memref<8x32xf32, #tpu.memory_space<vmem>>, vector<8x8xf32>,
    %48 = vector.extract_strided_slice %11 {offsets = [0, 16], sizes = [8, 8], strides = [1, 1]} : vector<8x32xbf16> to vector<8x8xbf16>
    %49 = vector.extract_strided_slice %12 {offsets = [0, 16], sizes = [8, 8], strides = [1, 1]} : vector<8x32xbf16> to vector<8x8xbf16>
    %50 = vector.extract_strided_slice %13 {offsets = [0, 16], sizes = [8, 8], strides = [1, 1]} : vector<8x32xbf16> to vector<8x8xbf16>
    %cst_22 = arith.constant dense<0.000000e+00> : vector<8x8xf32>
    %51 = tpu.matmul %48, %49, %cst_22 {dimension_numbers = #tpu.dot_dimension_numbers<[1], [1], [0], [0], [0, 0, 1, 0], [], []>} : vector<8x8xbf16>, vector<8x8xbf16>, vector<8x8xf32> -> vector<8x8xf32>
    %cst_23 = arith.constant dense<0xFF800000> : vector<8xf32>
    %52 = vector.multi_reduction <maximumf>, %51, %cst_23 [1] : vector<8x8xf32> to vector<8xf32>
    %53 = vector.shape_cast %52 : vector<8xf32> to vector<8x1xf32>
    %54 = vector.broadcast %53 : vector<8x1xf32> to vector<8x8xf32>
    %55 = arith.subf %51, %54 : vector<8x8xf32>
    %56 = math.exp %55 : vector<8x8xf32>
    %cst_24 = arith.constant dense<0.000000e+00> : vector<8xf32>
    %57 = vector.multi_reduction <add>, %56, %cst_24 [1] : vector<8x8xf32> to vector<8xf32>
    %58 = vector.shape_cast %57 : vector<8xf32> to vector<8x1xf32>
    %59 = tpu.reciprocal %58 {approx = true} : vector<8x1xf32> -> vector<8x1xf32>
    %60 = vector.broadcast %59 : vector<8x1xf32> to vector<8x8xf32>
    %61 = arith.mulf %56, %60 : vector<8x8xf32>
    %62 = arith.truncf %61 : vector<8x8xf32> to vector<8x8xbf16>
    %cst_25 = arith.constant dense<0.000000e+00> : vector<8x8xf32>
    %63 = tpu.matmul %62, %50, %cst_25 {dimension_numbers = #tpu.dot_dimension_numbers<[1], [0], [0], [1], [0, 0, 1, 1], [], []>} : vector<8x8xbf16>, vector<8x8xbf16>, vector<8x8xf32> -> vector<8x8xf32>
    %c0_26 = arith.constant 0 : index
    %c16 = arith.constant 16 : index
    %64 = vector.load %arg21[%c0_26, %c16] : memref<8x32xf32, #tpu.memory_space<vmem>>, vector<8x8xf32>
    tpu.vector_store %arg21[%c0_26, %c16], %63 {strides = array<i32>} : memref<8x32xf32, #tpu.memory_space<vmem>>, vector<8x8xf32>,
    %65 = vector.extract_strided_slice %11 {offsets = [0, 24], sizes = [8, 8], strides = [1, 1]} : vector<8x32xbf16> to vector<8x8xbf16>
    %66 = vector.extract_strided_slice %12 {offsets = [0, 24], sizes = [8, 8], strides = [1, 1]} : vector<8x32xbf16> to vector<8x8xbf16>
    %67 = vector.extract_strided_slice %13 {offsets = [0, 24], sizes = [8, 8], strides = [1, 1]} : vector<8x32xbf16> to vector<8x8xbf16>
    %cst_27 = arith.constant dense<0.000000e+00> : vector<8x8xf32>
    %68 = tpu.matmul %65, %66, %cst_27 {dimension_numbers = #tpu.dot_dimension_numbers<[1], [1], [0], [0], [0, 0, 1, 0], [], []>} : vector<8x8xbf16>, vector<8x8xbf16>, vector<8x8xf32> -> vector<8x8xf32>
    %cst_28 = arith.constant dense<0xFF800000> : vector<8xf32>
    %69 = vector.multi_reduction <maximumf>, %68, %cst_28 [1] : vector<8x8xf32> to vector<8xf32>
    %70 = vector.shape_cast %69 : vector<8xf32> to vector<8x1xf32>
    %71 = vector.broadcast %70 : vector<8x1xf32> to vector<8x8xf32>
    %72 = arith.subf %68, %71 : vector<8x8xf32>
    %73 = math.exp %72 : vector<8x8xf32>
    %cst_29 = arith.constant dense<0.000000e+00> : vector<8xf32>
    %74 = vector.multi_reduction <add>, %73, %cst_29 [1] : vector<8x8xf32> to vector<8xf32>
    %75 = vector.shape_cast %74 : vector<8xf32> to vector<8x1xf32>
    %76 = tpu.reciprocal %75 {approx = true} : vector<8x1xf32> -> vector<8x1xf32>
    %77 = vector.broadcast %76 : vector<8x1xf32> to vector<8x8xf32>
    %78 = arith.mulf %73, %77 : vector<8x8xf32>
    %79 = arith.truncf %78 : vector<8x8xf32> to vector<8x8xbf16>
    %cst_30 = arith.constant dense<0.000000e+00> : vector<8x8xf32>
    %80 = tpu.matmul %79, %67, %cst_30 {dimension_numbers = #tpu.dot_dimension_numbers<[1], [0], [0], [1], [0, 0, 1, 1], [], []>} : vector<8x8xbf16>, vector<8x8xbf16>, vector<8x8xf32> -> vector<8x8xf32>
    %c0_31 = arith.constant 0 : index
    %c24 = arith.constant 24 : index
    %81 = vector.load %arg21[%c0_31, %c24] : memref<8x32xf32, #tpu.memory_space<vmem>>, vector<8x8xf32>
    tpu.vector_store %arg21[%c0_31, %c24], %80 {strides = array<i32>} : memref<8x32xf32, #tpu.memory_space<vmem>>, vector<8x8xf32>,
    %c0_32 = arith.constant 0 : index
    %c0_33 = arith.constant 0 : index
    %82 = vector.load %arg21[%c0_32, %c0_33] : memref<8x32xf32, #tpu.memory_space<vmem>>, vector<8x32xf32>
    %83 = arith.truncf %82 : vector<8x32xf32> to vector<8x32xbf16>
    %c0_34 = arith.constant 0 : index
    %c0_35 = arith.constant 0 : index
    %84 = vector.load %arg8[%c0_34, %c0_35] : memref<32x32xbf16, #tpu.memory_space<vmem>>, vector<32x32xbf16>
    %cst_36 = arith.constant dense<0.000000e+00> : vector<8x32xf32>
    %85 = tpu.matmul %83, %84, %cst_36 {dimension_numbers = #tpu.dot_dimension_numbers<[1], [0], [0], [1], [0, 0, 1, 1], [], []>} : vector<8x32xbf16>, vector<32x32xbf16>, vector<8x32xf32> -> vector<8x32xf32>
    %c0_37 = arith.constant 0 : index
    %c0_38 = arith.constant 0 : index
    %86 = vector.load %arg9[%c0_37, %c0_38] : memref<1x32xf32, #tpu.memory_space<vmem>>, vector<1x32xf32>
    %87 = vector.broadcast %86 : vector<1x32xf32> to vector<8x32xf32>
    %88 = arith.addf %85, %87 : vector<8x32xf32>
    %89 = arith.addf %4, %88 : vector<8x32xf32>
    %c0_39 = arith.constant 0 : index
    %c0_40 = arith.constant 0 : index
    %90 = vector.load %arg10[%c0_39, %c0_40] : memref<1x32xf32, #tpu.memory_space<vmem>>, vector<1x32xf32>
    %c0_41 = arith.constant 0 : index
    %c0_42 = arith.constant 0 : index
    %91 = vector.load %arg11[%c0_41, %c0_42] : memref<1x32xf32, #tpu.memory_space<vmem>>, vector<1x32xf32>
    %cst_43 = arith.constant dense<0.000000e+00> : vector<8xf32>
    %92 = vector.multi_reduction <add>, %89, %cst_43 [1] : vector<8x32xf32> to vector<8xf32>
    %93 = vector.shape_cast %92 : vector<8xf32> to vector<8x1xf32>
    %cst_44 = arith.constant 3.200000e+01 : f32
    %94 = vector.broadcast %cst_44 : f32 to vector<8x1xf32>
    %95 = arith.divf %93, %94 : vector<8x1xf32>
    %96 = vector.broadcast %95 : vector<8x1xf32> to vector<8x32xf32>
    %97 = arith.subf %89, %96 : vector<8x32xf32>
    %98 = arith.mulf %97, %97 : vector<8x32xf32>
    %cst_45 = arith.constant dense<0.000000e+00> : vector<8xf32>
    %99 = vector.multi_reduction <add>, %98, %cst_45 [1] : vector<8x32xf32> to vector<8xf32>
    %100 = vector.shape_cast %99 : vector<8xf32> to vector<8x1xf32>
    %cst_46 = arith.constant 3.200000e+01 : f32
    %101 = vector.broadcast %cst_46 : f32 to vector<8x1xf32>
    %102 = arith.divf %100, %101 : vector<8x1xf32>
    %103 = vector.broadcast %95 : vector<8x1xf32> to vector<8x32xf32>
    %104 = arith.subf %89, %103 : vector<8x32xf32>
    %cst_47 = arith.constant 9.99999974E-6 : f32
    %105 = vector.broadcast %cst_47 : f32 to vector<8x1xf32>
    %106 = arith.addf %102, %105 : vector<8x1xf32>
    %107 = math.rsqrt %106 : vector<8x1xf32>
    %108 = vector.broadcast %107 : vector<8x1xf32> to vector<8x32xf32>
    %109 = arith.mulf %104, %108 : vector<8x32xf32>
    %110 = vector.broadcast %90 : vector<1x32xf32> to vector<8x32xf32>
    %111 = arith.mulf %109, %110 : vector<8x32xf32>
    %112 = vector.broadcast %91 : vector<1x32xf32> to vector<8x32xf32>
    %113 = arith.addf %111, %112 : vector<8x32xf32>
    %114 = arith.truncf %113 : vector<8x32xf32> to vector<8x32xbf16>
    %c0_48 = arith.constant 0 : index
    %c0_49 = arith.constant 0 : index
    %115 = vector.load %arg12[%c0_48, %c0_49] : memref<32x64xbf16, #tpu.memory_space<vmem>>, vector<32x64xbf16>
    %cst_50 = arith.constant dense<0.000000e+00> : vector<8x64xf32>
    %116 = tpu.matmul %114, %115, %cst_50 {dimension_numbers = #tpu.dot_dimension_numbers<[1], [0], [0], [1], [0, 0, 1, 1], [], []>} : vector<8x32xbf16>, vector<32x64xbf16>, vector<8x64xf32> -> vector<8x64xf32>
    %c0_51 = arith.constant 0 : index
    %c0_52 = arith.constant 0 : index
    %117 = vector.load %arg13[%c0_51, %c0_52] : memref<1x64xf32, #tpu.memory_space<vmem>>, vector<1x64xf32>
    %118 = vector.broadcast %117 : vector<1x64xf32> to vector<8x64xf32>
    %119 = arith.addf %116, %118 : vector<8x64xf32>
    %cst_53 = arith.constant 0.000000e+00 : f32
    %120 = vector.broadcast %cst_53 : f32 to vector<8x64xf32>
    %121 = arith.maximumf %119, %120 : vector<8x64xf32>
    %122 = arith.truncf %121 : vector<8x64xf32> to vector<8x64xbf16>
    %c0_54 = arith.constant 0 : index
    %c0_55 = arith.constant 0 : index
    %123 = vector.load %arg14[%c0_54, %c0_55] : memref<64x32xbf16, #tpu.memory_space<vmem>>, vector<64x32xbf16>
    %cst_56 = arith.constant dense<0.000000e+00> : vector<8x32xf32>
    %124 = tpu.matmul %122, %123, %cst_56 {dimension_numbers = #tpu.dot_dimension_numbers<[1], [0], [0], [1], [0, 0, 1, 1], [], []>} : vector<8x64xbf16>, vector<64x32xbf16>, vector<8x32xf32> -> vector<8x32xf32>
    %c0_57 = arith.constant 0 : index
    %c0_58 = arith.constant 0 : index
    %125 = vector.load %arg15[%c0_57, %c0_58] : memref<1x32xf32, #tpu.memory_space<vmem>>, vector<1x32xf32>
    %126 = vector.broadcast %125 : vector<1x32xf32> to vector<8x32xf32>
    %127 = arith.addf %124, %126 : vector<8x32xf32>
    %128 = arith.addf %113, %127 : vector<8x32xf32>
    %c0_59 = arith.constant 0 : index
    %c0_60 = arith.constant 0 : index
    %129 = vector.load %arg16[%c0_59, %c0_60] : memref<1x32xf32, #tpu.memory_space<vmem>>, vector<1x32xf32>
    %c0_61 = arith.constant 0 : index
    %c0_62 = arith.constant 0 : index
    %130 = vector.load %arg17[%c0_61, %c0_62] : memref<1x32xf32, #tpu.memory_space<vmem>>, vector<1x32xf32>
    %cst_63 = arith.constant dense<0.000000e+00> : vector<8xf32>
    %131 = vector.multi_reduction <add>, %128, %cst_63 [1] : vector<8x32xf32> to vector<8xf32>
    %132 = vector.shape_cast %131 : vector<8xf32> to vector<8x1xf32>
    %cst_64 = arith.constant 3.200000e+01 : f32
    %133 = vector.broadcast %cst_64 : f32 to vector<8x1xf32>
    %134 = arith.divf %132, %133 : vector<8x1xf32>
    %135 = vector.broadcast %134 : vector<8x1xf32> to vector<8x32xf32>
    %136 = arith.subf %128, %135 : vector<8x32xf32>
    %137 = arith.mulf %136, %136 : vector<8x32xf32>
    %cst_65 = arith.constant dense<0.000000e+00> : vector<8xf32>
    %138 = vector.multi_reduction <add>, %137, %cst_65 [1] : vector<8x32xf32> to vector<8xf32>
    %139 = vector.shape_cast %138 : vector<8xf32> to vector<8x1xf32>
    %cst_66 = arith.constant 3.200000e+01 : f32
    %140 = vector.broadcast %cst_66 : f32 to vector<8x1xf32>
    %141 = arith.divf %139, %140 : vector<8x1xf32>
    %142 = vector.broadcast %134 : vector<8x1xf32> to vector<8x32xf32>
    %143 = arith.subf %128, %142 : vector<8x32xf32>
    %cst_67 = arith.constant 9.99999974E-6 : f32
    %144 = vector.broadcast %cst_67 : f32 to vector<8x1xf32>
    %145 = arith.addf %141, %144 : vector<8x1xf32>
    %146 = math.rsqrt %145 : vector<8x1xf32>
    %147 = vector.broadcast %146 : vector<8x1xf32> to vector<8x32xf32>
    %148 = arith.mulf %143, %147 : vector<8x32xf32>
    %149 = vector.broadcast %129 : vector<1x32xf32> to vector<8x32xf32>
    %150 = arith.mulf %148, %149 : vector<8x32xf32>
    %151 = vector.broadcast %130 : vector<1x32xf32> to vector<8x32xf32>
    %152 = arith.addf %150, %151 : vector<8x32xf32>
    %c0_68 = arith.constant 0 : index
    %c0_69 = arith.constant 0 : index
    %c0_70 = arith.constant 0 : index
    %153 = vector.load %arg18[%c0_68, %c0_69, %c0_70] : memref<1x8x32xf32, #tpu.memory_space<vmem>>, vector<1x8x32xf32>
    %154 = vector.shape_cast %153 : vector<1x8x32xf32> to vector<8x32xf32>
    %155 = vector.shape_cast %152 : vector<8x32xf32> to vector<1x8x32xf32>
    tpu.vector_store %arg18[%c0_68, %c0_69, %c0_70], %155 {strides = array<i32>} : memref<1x8x32xf32, #tpu.memory_space<vmem>>, vector<1x8x32xf32>,
    return
  }
  func.func @transform_0(%arg0: i32, %arg1: i32) -> (i32, i32, i32) {
    %c0_i32 = arith.constant 0 : i32
    %c0_i32_0 = arith.constant 0 : i32
    return %arg0, %arg1, %c0_i32 : i32, i32, i32
  }
  func.func @transform_1(%arg0: i32, %arg1: i32) -> (i32, i32, i32) {
    %c0_i32 = arith.constant 0 : i32
    %c0_i32_0 = arith.constant 0 : i32
    %c0_i32_1 = arith.constant 0 : i32
    return %arg0, %c0_i32, %c0_i32_0 : i32, i32, i32
  }
  func.func @transform_2(%arg0: i32, %arg1: i32) -> (i32, i32) {
    %c0_i32 = arith.constant 0 : i32
    %c0_i32_0 = arith.constant 0 : i32
    %c0_i32_1 = arith.constant 0 : i32
    return %c0_i32, %c0_i32_0 : i32, i32
  }
  func.func @transform_3(%arg0: i32, %arg1: i32) -> (i32, i32) {
    %c0_i32 = arith.constant 0 : i32
    %c0_i32_0 = arith.constant 0 : i32
    %c0_i32_1 = arith.constant 0 : i32
    return %c0_i32, %c0_i32_0 : i32, i32
  }
  func.func @transform_4(%arg0: i32, %arg1: i32) -> (i32, i32) {
    %c0_i32 = arith.constant 0 : i32
    %c0_i32_0 = arith.constant 0 : i32
    %c0_i32_1 = arith.constant 0 : i32
    return %c0_i32, %c0_i32_0 : i32, i32
  }
  func.func @transform_5(%arg0: i32, %arg1: i32) -> (i32, i32) {
    %c0_i32 = arith.constant 0 : i32
    %c0_i32_0 = arith.constant 0 : i32
    %c0_i32_1 = arith.constant 0 : i32
    return %c0_i32, %c0_i32_0 : i32, i32
  }
  func.func @transform_6(%arg0: i32, %arg1: i32) -> (i32, i32) {
    %c0_i32 = arith.constant 0 : i32
    %c0_i32_0 = arith.constant 0 : i32
    %c0_i32_1 = arith.constant 0 : i32
    return %c0_i32, %c0_i32_0 : i32, i32
  }
  func.func @transform_7(%arg0: i32, %arg1: i32) -> (i32, i32) {
    %c0_i32 = arith.constant 0 : i32
    %c0_i32_0 = arith.constant 0 : i32
    %c0_i32_1 = arith.constant 0 : i32
    return %c0_i32, %c0_i32_0 : i32, i32
  }
  func.func @transform_8(%arg0: i32, %arg1: i32) -> (i32, i32) {
    %c0_i32 = arith.constant 0 : i32
    %c0_i32_0 = arith.constant 0 : i32
    %c0_i32_1 = arith.constant 0 : i32
    return %c0_i32, %c0_i32_0 : i32, i32
  }
  func.func @transform_9(%arg0: i32, %arg1: i32) -> (i32, i32) {
    %c0_i32 = arith.constant 0 : i32
    %c0_i32_0 = arith.constant 0 : i32
    %c0_i32_1 = arith.constant 0 : i32
    return %c0_i32, %c0_i32_0 : i32, i32
  }
  func.func @transform_10(%arg0: i32, %arg1: i32) -> (i32, i32) {
    %c0_i32 = arith.constant 0 : i32
    %c0_i32_0 = arith.constant 0 : i32
    %c0_i32_1 = arith.constant 0 : i32
    return %c0_i32, %c0_i32_0 : i32, i32
  }
  func.func @transform_11(%arg0: i32, %arg1: i32) -> (i32, i32) {
    %c0_i32 = arith.constant 0 : i32
    %c0_i32_0 = arith.constant 0 : i32
    %c0_i32_1 = arith.constant 0 : i32
    return %c0_i32, %c0_i32_0 : i32, i32
  }
  func.func @transform_12(%arg0: i32, %arg1: i32) -> (i32, i32) {
    %c0_i32 = arith.constant 0 : i32
    %c0_i32_0 = arith.constant 0 : i32
    %c0_i32_1 = arith.constant 0 : i32
    return %c0_i32, %c0_i32_0 : i32, i32
  }
  func.func @transform_13(%arg0: i32, %arg1: i32) -> (i32, i32) {
    %c0_i32 = arith.constant 0 : i32
    %c0_i32_0 = arith.constant 0 : i32
    %c0_i32_1 = arith.constant 0 : i32
    return %c0_i32, %c0_i32_0 : i32, i32
  }
  func.func @transform_14(%arg0: i32, %arg1: i32) -> (i32, i32) {
    %c0_i32 = arith.constant 0 : i32
    %c0_i32_0 = arith.constant 0 : i32
    %c0_i32_1 = arith.constant 0 : i32
    return %c0_i32, %c0_i32_0 : i32, i32
  }
  func.func @transform_15(%arg0: i32, %arg1: i32) -> (i32, i32) {
    %c0_i32 = arith.constant 0 : i32
    %c0_i32_0 = arith.constant 0 : i32
    %c0_i32_1 = arith.constant 0 : i32
    return %c0_i32, %c0_i32_0 : i32, i32
  }
  func.func @transform_16(%arg0: i32, %arg1: i32) -> (i32, i32, i32) {
    %c0_i32 = arith.constant 0 : i32
    %c0_i32_0 = arith.constant 0 : i32
    return %arg0, %arg1, %c0_i32 : i32, i32, i32
  }
}

</mosaic_0001>

<bundles_post_ra>
// kernel: tpu_custom_call.1
= control target key start
LH: loop header
LB: loop body
LE: loop exit
PB: predicated region body
PF: predicated region fallthrough
CT: control target
= control target key end

     0   :  { %s2627_s0 = inlined_call_operand.vmem [shape: f32[2,8,32], index: 0, kind: input, shape index: {}]   ;;  %s2628_s1 = inlined_call_operand.hbm [shape: bf16[2,8,32], index: 1, kind: input, shape index: {}]   ;;  %s2629_s2 = inlined_call_operand.vmem [shape: bf16[32,32], index: 2, kind: input, shape index: {}]   ;;  %s2630_s3 = inlined_call_operand.vmem [shape: f32[1,32], index: 3, kind: input, shape index: {}]   ;;  %s2631_s4 = inlined_call_operand.vmem [shape: bf16[32,64], index: 4, kind: input, shape index: {}]   ;;  %s2632_s5 = inlined_call_operand.vmem [shape: f32[1,64], index: 5, kind: input, shape index: {}]   ;;  %s2633_s6 = inlined_call_operand.hbm [shape: bf16[32,32], index: 6, kind: input, shape index: {}]   ;;  %s2634_s7 = inlined_call_operand.vmem [shape: f32[1,32], index: 7, kind: input, shape index: {}]   ;;  %s2635_s8 = inlined_call_operand.vmem [shape: f32[1,32], index: 8, kind: input, shape index: {}]   ;;  %s2636_s9 = inlined_call_operand.vmem [shape: f32[1,32], index: 9, kind: input, shape index: {}]   ;;  %s2637_s10 = inlined_call_operand.hbm [shape: bf16[32,64], index: 10, kind: input, shape index: {}]   ;;  %s2638_s11 = inlined_call_operand.hbm [shape: f32[1,64], index: 11, kind: input, shape index: {}]   ;;  %s2639_s12 = inlined_call_operand.vmem [shape: bf16[64,32], index: 12, kind: input, shape index: {}]   ;;  %s2640_s13 = inlined_call_operand.vmem [shape: f32[1,32], index: 13, kind: input, shape index: {}]   ;;  %s2641_s14 = inlined_call_operand.vmem [shape: f32[1,32], index: 14, kind: input, shape index: {}]   ;;  %s2642_s15 = inlined_call_operand.vmem [shape: f32[1,32], index: 15, kind: input, shape index: {}]   ;;  %s2643_s16 = inlined_call_operand.hbm [shape: f32[2,8,32], index: 16, kind: output, shape index: {}]  }
   0x1   :  { %2651 = sst [smem:[#allocation21_spill]] %s2627_s0 }
   0x2   :  { %2652 = sst [smem:[#allocation22_spill]] %s2633_s6 }
   0x3   :  { %2653 = sst [smem:[#allocation23_spill]] %s2636_s9 }
   0x4   :  { %2654 = sst [smem:[#allocation24_spill]] %s2637_s10 }
   0x5   :  { %2655 = sst [smem:[#allocation25_spill]] %s2638_s11 }
   0x6   :  { %2656 = sst [smem:[#allocation26_spill]] %s2640_s13 }
   0x7   :  { %2657 = sst [smem:[#allocation27_spill]] %s2641_s14 }
   0x8   :  { %2658 = sst [smem:[#allocation28_spill]] %s2642_s15 }
   0x9   :  { %2659 = sst [smem:[#allocation29_spill]] %s2643_s16 }
   0xa   :  { %21 = vsyncpa [#allocation6], 0 }
   0xb   :  { %23 = vsyncpa [#allocation6 + $0x1], 0 }
   0xc   :  { %24 = vsyncpa [#allocation9], 0 }
   0xd   :  { %25 = vsyncpa [#allocation12], 0 }
   0xe   :  { %26 = vsyncpa [#allocation7], 0 }
   0xf   :  { %28 = vsyncpa [#allocation7 + $0x1], 0  ;;  %s2287_s21 = smov 0   ;;  %s2289_s22 = smov 0  }
  0x10   :  { %s2291_s23 = smov 0   ;;  %s2293_s24 = smov 0  }
  0x11   :  { %s2295_s25 = smov 0   ;;  %s2297_s26 = smov 0  }
  0x12 LB: > { %2660 = sst [smem:[#allocation18_spill]] %s2164_s21  ;;  %s1668_s27 = sadd.s32 4294967295, %s2184_s26   ;;  %s2184_s26 = sphi %s2297_s26, %s34_s26   ;;  %s2180_s25 = sphi %s2295_s25, %s2691_s25   ;;  %s2176_s24 = sphi %s2293_s24, %s2690_s24   ;;  %s2172_s23 = sphi %s2291_s23, %s2689_s23   ;;  %s2168_s22 = sphi %s2289_s22, %s2688_s22   ;;  %s2164_s21 = sphi %s2287_s21, %s2687_s21  }
  0x13   : > { %s1669_s28 = sadd.s32 4294967294, %s2184_s26   ;;  %p94_p0 = scmp.ne.s32.totalorder %s2168_s22, %s2164_s21 }
  0x14   : > { %p2321_p1 = scmp.eq.s32.totalorder %s1668_s27, 0  ;;  %p2325_p2 = scmp.eq.s32.totalorder %s1668_s27, 1 }
  0x15   : > { %p420_p3 = scmp.eq.s32.totalorder %s1669_s28, 1  ;;  %p1670_p5 = scmp.ge.s32.totalorder %s2184_s26, 1 }
  0x16   : > { %s2661_s29 = scalar_select %p2321_p1, 1, 0 }
  0x17   : > { %p2331_p4 = por %p2321_p1, %p94_p0  ;;  %p2336_p6 = por %p420_p3, %p94_p0 }
  0x18   : > { %p427_p7 = scmp.lt.s32.totalorder %s2184_s26, 3  ;;  %s2186_s19 = smov [#allocation8]  }
  0x19   : > { %s2663_s0 = scalar_select %p2331_p4, 1, 0 }
  0x1a   : > { %s2664_s17 = scalar_select %p2336_p6, 1, 0 }
  0x1b   : > { %p2341_p8 = pnand %p1670_p5, %p427_p7  ;;  %s451_s20 = sshll.u32 %s2186_s19, 4  ;;  %s452_s20 = int_to_ptr.vmem [resolvable:$true] %s451_s20 }
  0x1c   : > { %2665 = sst [smem:[#allocation19_spill]] %s2664_s17  ;;  %s2187_s28 = smov [#allocation10]  }
  0x1d   : > { %p1868_p9 = pneg %p2341_p8  ;;  %s473_s17 = sshll.u32 %s2187_s28, 4  ;;  %s474_s17 = int_to_ptr.vmem [resolvable:$true] %s473_s17 }
  0x1e   : > { %s2188_s21 = smov [#allocation11]   ;;  %s2001_s15 = scalar_lea.vmem %s452_s20, 256 }
  0x1f   : > { %p2350_p11 = pnand %p1868_p9, %p2321_p1  ;;  %s487_s16 = sshll.u32 %s2188_s21, 4  ;;  %s488_s16 = int_to_ptr.vmem [resolvable:$true] %s487_s16 }
  0x20   : > { %p2002_p13 = scmp.ne.s32.totalorder %s452_s20, %s2001_s15  ;;  %p2009_p5 = scmp.lt.s32.totalorder %s452_s20, %s452_s20 }
  0x21   : > { %p1992_p12 = pneg %p2350_p11  ;;  %p2010_p7 = scmp.lt.s32.totalorder %s2001_s15, %s2001_s15 }
  0x23   : > { %p2004_p0 = pnand %p2002_p13, %p1992_p12  ;;  %p2011_p9 = por %p2010_p7, %p2009_p5 }
  0x25   : > { %p2005_p3 = pneg %p2004_p0 }
  0x27   : > { %p2012_p10 = pnand %p2011_p9, %p2005_p3 }
  0x29   : > { %2015 = shalt.err (!%p2012_p10)
}
  0x2a   : > { %s2189_s19 = smov 64   ;;  %s2190_s28 = smov 4  }
  0x2b   : > { %s2668_s6 = sld [smem:[#allocation22_spill]]  ;;  %s2027_s13 = scalar_lea.vmem %s474_s17, 256 }
  0x2c   : > { %p2028_p6 = scmp.ne.s32.totalorder %s474_s17, %s2027_s13  ;;  %p2035_p1 = scmp.lt.s32.totalorder %s474_s17, %s474_s17 }
  0x2d   : > { %p2036_p4 = scmp.lt.s32.totalorder %s2027_s13, %s2027_s13 }
  0x2e   : > { %p2030_p13 = pnand %p2028_p6, %p1992_p12 }
  0x2f   : > { %p2037_p5 = por %p2036_p4, %p2035_p1 }
  0x30   : > { %p2031_p0 = pneg %p2030_p13 }
  0x31   : > { %1871 = dma.hbm_to_vmem [thread:$0]  (!%p2350_p11), %s2668_s6, 256, %s452_s20, [#allocation9], %s2189_s19, %s2189_s19, %s2190_s28  }
  0x32   : > { %p2038_p3 = pnand %p2037_p5, %p2031_p0 }
  0x34   : > { %2041 = shalt.err (!%p2038_p3)
}
  0x35   : > { %s2669_s10 = sld [smem:[#allocation24_spill]]  ;;  %s2053_s14 = scalar_lea.vmem %s488_s16, 16 }
  0x36   : > { %p2054_p10 = scmp.ne.s32.totalorder %s488_s16, %s2053_s14  ;;  %s2060_s20 = scalar_lea.vmem %s488_s16, 32 }
  0x37   : > { %p2061_p9 = scmp.lt.s32.totalorder %s488_s16, %s488_s16  ;;  %p2062_p13 = scmp.lt.s32.totalorder %s2060_s20, %s2053_s14 }
  0x38   : > { %p2056_p7 = pnand %p2054_p10, %p1992_p12 }
  0x39   : > { %p2063_p1 = por %p2062_p13, %p2061_p9 }
  0x3a   : > { %p2057_p6 = pneg %p2056_p7 }
  0x3b   : > { %1874 = dma.hbm_to_vmem [thread:$0]  (!%p2350_p11), %s2669_s10, 256, %s474_s17, [#allocation9], %s2189_s19, %s2189_s19, %s2190_s28  }
  0x3c   : > { %p2064_p4 = pnand %p2063_p1, %p2057_p6 }
  0x3e   : > { %2067 = shalt.err (!%p2064_p4)
}
  0x3f   : > { %s2670_s11 = sld [smem:[#allocation25_spill]]  ;;  %s81_s9 = sadd.s32 1, %s2172_s23 }
  0x40   : > { %s46_s17 = sadd.s32 1, %s2180_s25  ;;  %p88_p12 = scmp.ne.s32.totalorder %s2172_s23, %s2168_s22 }
  0x41   : > { %p48_p0 = scmp.ge.s32.totalorder %s46_s17, 2  ;;  %p89_p5 = scmp.eq.s32.totalorder %s2184_s26, 0 }
  0x42   : > { %p2387_p3 = por %p2325_p2, %p88_p12  ;;  %p1889_p10 = scmp.lt.s32.totalorder %s2184_s26, 2 }
  0x43   : > { %s2693_s17 = smov (%p48_p0, %s46_s17), 0  ;;  %p90_p7 = por %p89_p5, %p88_p12 }
  0x44   : > { %2672 = sst [smem:[#allocation20_spill]] %s2693_s17  ;;  %s520_s19 = sand.u32 1, %s2172_s23  }
  0x45   : > { %1877 = dma.hbm_to_vmem [thread:$0]  (!%p2350_p11), %s2670_s11, 16, %s488_s16, [#allocation12]  }
  0x46   : > { %s78_s28 = ssub.s32 %s2180_s25, %s2693_s17  ;;  %s1675_s16 = sshll.u32 %s520_s19, 2 }
  0x47   : > { %p79_p6 = scmp.eq.s32.totalorder %s78_s28, 0  ;;  %s1676_s15 = sshll.u32 %s2180_s25, 6 }
  0x48   : > { %s529_s30 = scalar_lea.hbm %s2628_s1, %s1676_s15  ;;  %s524_s21 = scalar_lea.vmem [#allocation5], %s1675_s16 }
  0x49   : > { %s2399_s14 = scalar_select %p79_p6, %s2172_s23, %s81_s9  }
  0x4a   : > { %s531_s6 = sshll.u32 %s524_s21, 4  ;;  %p2406_p2 = pnand %p1889_p10, %p90_p7  ;;  %s532_s6 = int_to_ptr.vmem [resolvable:$true] %s531_s6 }
  0x4b   : > { %s521_s11 = scalar_lea.sflag [#allocation6], %s520_s19  ;;  %s2081_s28 = scalar_lea.vmem %s532_s6, 64 }
  0x4c   : > { %p2070_p11 = pneg %p2406_p2  ;;  %p2082_p9 = scmp.ne.s32.totalorder %s532_s6, %s2081_s28 }
  0x4d   : > { %s2191_s9 = smov [#allocation5]  }
  0x4e   : > { %p2084_p13 = pnand %p2082_p9, %p2070_p11  ;;  %s2086_s17 = sshll.u32 %s2191_s9, 4  ;;  %s2087_s17 = int_to_ptr.vmem [resolvable:$false] %s2086_s17 }
  0x4f   : > { %s2088_s15 = scalar_lea.vmem %s2087_s17, 128  ;;  %p2089_p4 = scmp.lt.s32.totalorder %s532_s6, %s2087_s17 }
  0x50   : > { %p2085_p1 = pneg %p2084_p13  ;;  %p2090_p12 = scmp.lt.s32.totalorder %s2088_s15, %s2081_s28 }
  0x52   : > { %p2091_p0 = por %p2090_p12, %p2089_p4 }
  0x54   : > { %p2092_p5 = pnand %p2091_p0, %p2085_p1 }
  0x56   : > { %2095 = shalt.err (!%p2092_p5)
}
  0x57   : > { %1881 = dma.hbm_to_vmem [thread:$0]  (!%p2406_p2), %s529_s30, 64, %s532_s6, %s521_s11  }
  0x58   : > { %540 = sbr.rel (%p2341_p8) target bundleno = 2504 (0x9c8), region = 84  ;;  %s2417_s19 = sand.u32 (!%p2341_p8), 1, %s2168_s22  }
  0x59   : > { %s1678_s16 = sshll.u32 (!%p2341_p8), %s2417_s19, 2  ;;  %s543_s20 = scalar_lea.sflag (!%p2341_p8), [#allocation6], %s2417_s19 }
  0x5a   : > { %s546_s13 = scalar_lea.vmem (!%p2341_p8), [#allocation5], %s1678_s16  ;;  %p2674_p10 = scmp.ne.s32.totalorder (!%p2341_p8), %s2663_s0, 0 }
  0x5d   : > { %2147 = dma.done.wait (%p2674_p10), %s543_s20, 64  }
  0x5e   : > { %2149 = vsyncadd (%p2674_p10), %s543_s20, 4294967232  ;;  %p2675_p7 = scmp.ne.s32.totalorder %s2661_s29, 0 }
  0x60   : > { %2151 = dma.done.wait (%p2675_p7), [#allocation9], 512  }
  0x61   : > { %2153 = vsyncadd (%p2675_p7), [#allocation9], 4294966784 }
  0x62   : > { %2155 = dma.done.wait (%p2675_p7), [#allocation12], 16  }
  0x63   : > { %2157 = vsyncadd (%p2675_p7), [#allocation12], 4294967280  ;;  %v2192_v0 = vmov 0.0   ;;  %vm2193_vm0 = vmmov 0   ;;  %p614_p8 = scmp.lt.s32.totalorder %s2176_s24, 1  ;;  %v1956_v1 = vld [vmem:[%s2631_s4 + $0x8] sm:$0xff]  }
  0x64   : > { %1760 = vmatprep.subr.bf16.mxu1 %v2192_v0  ;;  %1764 = vmatprep.mubr.msk.bf16.mxu1 %vm2193_vm0, %v2192_v0  ;;  %v1957_v2 = vld [vmem:[%s2631_s4] sm:$0xff]   ;;  %vm643_vm1 = vcmask 261120   ;;  %v626_v3 = vld [vmem:[%s546_s13] sm:$0xf]  ;;  %v1958_v4 = vld [vmem:[%s2629_s2 + $0x8] sm:$0xff]   ;;  %s2676_s9 = sld [smem:[#allocation21_spill]] }
  0x65   : > { %1776 = vmatprep.subr.bf16.mxu0 %v2192_v0  ;;  %1778 = vmatprep.mubr.msk.bf16.mxu0 %vm2193_vm0, %v2192_v0  ;;  %s615_s11 = scalar_select %p614_p8, %s2176_s24, 1  ;;  %v1959_v5 = vld [vmem:[%s2629_s2] sm:$0xff]   ;;  %vm696_vm2 = vcmask 257024   ;;  %vm786_vm3 = vcmask 64512   ;;  %vm848_vm4 = vcmask 1043456   ;;  %vm1014_vm5 = vcmask 130112  }
  0x66   : > { %1761 = vmatpush3.bf16.msra.mxu1 %v1956_v1  ;;  %v1687_v8 = vld [vmem:[%s2632_s5] ss:$0 sm:$0xff]  ;;  %s2194_s29 = smov 112   ;;  %s2195_s0 = smov 120   ;;  %vm1130_vm6 = vcmask 195712   ;;  %vm1246_vm7 = vcmask 261312  }
  0x67   : > { %1762 = vmatprep.subr.bf16.mxu1 %v2192_v0  ;;  %s1683_s30 = sshll.u32 %s615_s11, 3  ;;  %v1690_v15 = vld [vmem:[%s2630_s3] ss:$0 sm:$0xff]  ;;  %s2196_s18 = smov 104   ;;  %vm1455_vm8 = vcmask 523264  }
  0x68   : > { %s2197_s17 = smov 96   ;;  %s2199_s21 = smov 16  }
  0x69   : > { %s2200_s28 = smov 24   ;;  %s2678_s16 = sld [smem:[#allocation26_spill]] }
  0x6a   : > { %1763 = vmatpush3.bf16.msra.mxu1 %v1957_v2  ;;  %s620_s15 = scalar_lea.vmem %s2676_s9, %s1683_s30  ;;  %s2198_s30 = smov 8  }
  0x6b   : > { %1768 = vmatprep.subr.bf16.mxu1 %v2192_v0  ;;  %v2461_v6 = vld [vmem:[%s620_s15] sm:$0xff]  ;;  %s1682_s20 = sshll.u32 %s2417_s19, 3  ;;  %s2679_s10 = sld [smem:[#allocation27_spill]] }
  0x6c   : > { %v715_v7 = vpack.c.bf16 %v2461_v6, %v2461_v6  ;;  %s2681_s9 = sld [smem:[#allocation29_spill]]  ;;  %s2201_s6 = smov [#allocation13]  }
  0x6d   : > { %1765 = vmatmul.mubr.msk.bf16.vlgmr.msra.gmra.mxu1 %vm643_vm1, %v626_v3 }
  0x6e   : > { %1769 = vmatpush3.bf16.msra.mxu1 %v1958_v4  ;;  %1772 = vmatprep.mubr.msk.bf16.mxu1 %vm2193_vm0, %v2192_v0 }
  0x6f   : > { %1770 = vmatprep.subr.bf16.mxu1 %v2192_v0 }
  0x72   : > { %1771 = vmatpush3.bf16.msra.mxu1 %v1959_v5 }
  0x73   : > { %1782 = vmatprep.subr.bf16.mxu1 %v2192_v0 }
  0x75   : > { %1773 = vmatmul.mubr.msk.bf16.vlgmr.msra.gmra.mxu1 %vm643_vm1, %v715_v7 }
  0x76   : > { %1784 = vmatprep.mubr.msk.bf16.mxu1 %vm2193_vm0, %v2192_v0 }
 0x12d   : > { %v681_v9 = vpop.f32.mrf.mxu1 }
 0x12e   : > { %v694_v10 = vadd.f32 %v1687_v8, %v681_v9 }
 0x12f   : > { %v1766_v11 = vpop.f32.mrf.mxu1 }
 0x130   : > { %v2473_v12 = vpack.c.bf16 %v694_v10, %v694_v10 }
 0x131   : > { %v684_v13 = vpop.f32.mrf.mxu1 }
 0x132   : > { %697 = vst.msk [vmem:[#allocation2] sm:$0xf] %vm696_vm2, %v2473_v12 }
 0x133   : > { %v1767_v14 = vpop.f32.mrf.mxu1 }
 0x135   : > { %v777_v16 = vpop.f32.mrf.mxu1 }
 0x136   : > { %v778_v18 = vadd.f32 %v1690_v15, %v777_v16 }
 0x137   : > { %v1774_v17 = vpop.f32.mrf.mxu1 }
 0x138   : > { %v783_v24 = vpack.c.bf16 %v778_v18, %v778_v18 }
 0x139   : > { %v784_v19 = vld [vmem:[#allocation2] sm:$0xf]  ;;  %v780_v20 = vpop.f32.mrf.mxu1 }
 0x13a   : > { %v791_v21 = vsel %vm786_vm3, %v784_v19, 0  ;;  %v1696_v22 = vcombine.low %v784_v19, %v784_v19 }
 0x13b   : > { %1777 = vmatpush3.bf16.xpose.msra.mxu0 %v791_v21  ;;  %v1775_v23 = vpop.f32.mrf.mxu1 }
 0x13c   : > { %1018 = vrot.lane.b32.xlu1 %v1696_v22, %s2194_s29  ;;  %899 = vrot.lane.b32.xlu0 %v1696_v22, %s2195_s0 }
 0x13d   : > { %1788 = vmatprep.subr.bf16.mxu0 %v2192_v0 }
 0x140   : > { %1016 = vrot.lane.b32.xlu1 %v783_v24, %s2194_s29  ;;  %894 = vrot.lane.b32.xlu0 %v783_v24, %s2195_s0 }
 0x142   : > { %1779 = vmatmul.mubr.msk.bf16.vlgmr.msra.gmra.mxu0 %vm786_vm3, %v783_v24 }
 0x143   : > { %1790 = vmatprep.mubr.msk.bf16.mxu0 %vm2193_vm0, %v2192_v0 }
 0x144   : > { %1132 = vrot.lane.b32.xlu1 %v783_v24, %s2196_s18  ;;  %1134 = vrot.lane.b32.xlu0 %v1696_v22, %s2196_s18 }
 0x1ae   : > { %v900_v25 = vpop.permute.xlu0 %899  ;;  %v1019_v27 = vpop.permute.xlu1 %1018 }
 0x1af   : > { %v905_v26 = vsel %vm786_vm3, %v900_v25, 0  ;;  %v1024_v29 = vsel %vm786_vm3, %v1019_v27, 0 }
 0x1b0   : > { %1789 = vmatpush3.bf16.xpose.msra.mxu0 %v905_v26 }
 0x1b1   : > { %1800 = vmatprep.subr.bf16.mxu0 %v2192_v0 }
 0x1b2   : > { %v895_v28 = vpop.permute.xlu0 %894  ;;  %v1017_v31 = vpop.permute.xlu1 %1016 }
 0x1b6   : > { %v1135_v30 = vpop.permute.xlu0 %1134  ;;  %v1133_v33 = vpop.permute.xlu1 %1132 }
 0x1b7   : > { %1791 = vmatmul.mubr.msk.bf16.vlgmr.msra.gmra.mxu0 %vm786_vm3, %v895_v28  ;;  %v1140_v32 = vsel %vm786_vm3, %v1135_v30, 0 }
 0x1b8   : > { %1801 = vmatpush3.bf16.xpose.msra.mxu0 %v1024_v29  ;;  %1802 = vmatprep.mubr.msk.bf16.mxu0 %vm2193_vm0, %v2192_v0 }
 0x1b9   : > { %1812 = vmatprep.subr.bf16.mxu0 %v2192_v0 }
 0x1bf   : > { %1803 = vmatmul.mubr.msk.bf16.vlgmr.msra.gmra.mxu0 %vm786_vm3, %v1017_v31 }
 0x1c0   : > { %1813 = vmatpush3.bf16.xpose.msra.mxu0 %v1140_v32  ;;  %1814 = vmatprep.mubr.msk.bf16.mxu0 %vm2193_vm0, %v2192_v0 }
 0x1c1   : > { %1824 = vmatprep.subr.bf16.mxu0 %v2192_v0 }
 0x1c7   : > { %1815 = vmatmul.mubr.msk.bf16.vlgmr.msra.gmra.mxu0 %vm786_vm3, %v1133_v33 }
 0x1c8   : > { %1828 = vmatprep.mubr.msk.bf16.mxu0 %vm2193_vm0, %v2192_v0 }
 0x202   : > { %v827_v34 = vpop.f32.mrf.mxu0 }
 0x203   : > { %v833_v35 = vsel %vm786_vm3, %v827_v34, -inf }
 0x204   : > { %834 = vmax.xlane.f32.xlu0 %v833_v35  ;;  %v1780_v36 = vpop.f32.mrf.mxu0 }
 0x206   : > { %v830_v37 = vpop.f32.mrf.mxu0 }
 0x208   : > { %v1781_v38 = vpop.f32.mrf.mxu0 }
 0x277   : > { %v941_v39 = vpop.f32.mrf.mxu0 }
 0x278   : > { %v947_v40 = vsel %vm786_vm3, %v941_v39, -inf }
 0x279   : > { %948 = vmax.xlane.f32.xlu1 %v947_v40  ;;  %v1792_v41 = vpop.f32.mrf.mxu0 }
 0x27b   : > { %v944_v42 = vpop.f32.mrf.mxu0 }
 0x27d   : > { %v1793_v43 = vpop.f32.mrf.mxu0 }
 0x27f   : > { %v1060_v44 = vpop.f32.mrf.mxu0 }
 0x280   : > { %v1066_v45 = vsel %vm786_vm3, %v1060_v44, -inf }
 0x281   : > { %1067 = vmax.xlane.f32.xlu0 %v1066_v45  ;;  %v1804_v46 = vpop.f32.mrf.mxu0  ;;  %v1962_v45 = vld [vmem:[#allocation8 + $0x8] sm:$0xff]  }
 0x282   : > { %1825 = vmatpush3.bf16.msra.mxu0 %v1962_v45 }
 0x283   : > { %v1063_v47 = vpop.f32.mrf.mxu0  ;;  %1826 = vmatprep.subr.bf16.mxu0 %v2192_v0 }
 0x284   : > { %v1963_v47 = vld [vmem:[#allocation8] sm:$0xff]  }
 0x285   : > { %v1805_v48 = vpop.f32.mrf.mxu0 }
 0x286   : > { %1827 = vmatpush3.bf16.msra.mxu0 %v1963_v47 }
 0x287   : > { %v1176_v49 = vpop.f32.mrf.mxu0  ;;  %1840 = vmatprep.subr.bf16.mxu0 %v2192_v0 }
 0x288   : > { %v1182_v50 = vsel %vm786_vm3, %v1176_v49, -inf }
 0x289   : > { %1183 = vmax.xlane.f32.xlu0 %v1182_v50  ;;  %v1816_v51 = vpop.f32.mrf.mxu0 }
 0x28a   : > { %710 = vrot.lane.b32.xlu1 %v2473_v12, %s2197_s17  ;;  %s613_s17 = scalar_lea.vmem [#allocation13], %s1682_s20 }
 0x28b   : > { %v1179_v52 = vpop.f32.mrf.mxu0 }
 0x28d   : > { %v835_v53 = vpop.xlane.xlu0 %834  ;;  %v1817_v54 = vpop.f32.mrf.mxu0 }
 0x28e   : > { %v836_v55 = vsub.f32 %v827_v34, %v835_v53 }
 0x290   : > { %v837_v56 = vmul.f32 1.442695, %v836_v55 }
 0x292   : > { %1970 = vpow2.f32 %v837_v56 }
 0x29f   : > { %v1971_v57 = vpop.eup %1970 }
 0x2a0   : > { %v839_v58 = vsel %vm786_vm3, %v1971_v57, 0.0 }
 0x2a1   : > { %840 = vadd.xlane.f32.xlu0 %v839_v58 }
 0x302   : > { %v949_v59 = vpop.xlane.xlu1 %948 }
 0x303   : > { %v950_v60 = vsub.f32 %v941_v39, %v949_v59 }
 0x305   : > { %v951_v61 = vmul.f32 1.442695, %v950_v60 }
 0x306   : > { %v711_v62 = vpop.permute.xlu1 %710 }
 0x307   : > { %1972 = vpow2.f32 %v951_v61  ;;  %713 = vst.msk [vmem:[#allocation3] sm:$0xf] %vm696_vm2, %v711_v62  ;;  %v1704_v61 = vld [vmem:[%s2634_s7] ss:$0 sm:$0xff] }
 0x30a   : > { %v1068_v63 = vpop.xlane.xlu0 %1067 }
 0x30b   : > { %v1069_v1 = vsub.f32 %v1060_v44, %v1068_v63 }
 0x30d   : > { %v1070_v2 = vmul.f32 1.442695, %v1069_v1 }
 0x30e   : > { %v785_v3 = vld [vmem:[#allocation3] sm:$0xf] }
 0x30f   : > { %1974 = vpow2.f32 %v1070_v2  ;;  %v850_v4 = vsel %vm848_vm4, %v785_v3, 0  ;;  %v1698_v5 = vcombine.low %v785_v3, %v785_v3 }
 0x310   : > { %1783 = vmatpush3.bf16.msra.mxu1 %v850_v4 }
 0x311   : > { %962 = vrot.lane.b32.xlu1 %v1698_v5, %s2195_s0  ;;  %1794 = vmatprep.subr.bf16.mxu1 %v2192_v0  ;;  %s2680_s0 = sld [smem:[#allocation28_spill]] }
 0x312   : > { %v1184_v7 = vpop.xlane.xlu0 %1183 }
 0x313   : > { %v1185_v8 = vsub.f32 %v1176_v49, %v1184_v7 }
 0x314   : > { %v1973_v9 = vpop.eup %1972 }
 0x315   : > { %v1186_v10 = vmul.f32 1.442695, %v1185_v8  ;;  %1194 = vrot.lane.b32.xlu1 %v1698_v5, %s2196_s18  ;;  %v953_v11 = vsel %vm786_vm3, %v1973_v9, 0.0  ;;  %s2677_s18 = sld [smem:[#allocation23_spill]] }
 0x316   : > { %954 = vadd.xlane.f32.xlu0 %v953_v11 }
 0x317   : > { %1976 = vpow2.f32 %v1186_v10 }
 0x31c   : > { %v1975_v12 = vpop.eup %1974 }
 0x31d   : > { %v1072_v13 = vsel %vm786_vm3, %v1975_v12, 0.0 }
 0x31e   : > { %1073 = vadd.xlane.f32.xlu0 %v1072_v13  ;;  %v1965_v13 = vld [vmem:[#allocation10] sm:$0xff]  }
 0x324   : > { %v1977_v14 = vpop.eup %1976 }
 0x325   : > { %v1188_v15 = vsel %vm786_vm3, %v1977_v14, 0.0 }
 0x326   : > { %1189 = vadd.xlane.f32.xlu0 %v1188_v15 }
 0x32a   : > { %v841_v16 = vpop.xlane.xlu0 %840 }
 0x32b   : > { %1978 = vrcp.f32 %v841_v16 }
 0x338   : > { %v1979_v17 = vpop.eup %1978 }
 0x339   : > { %v843_v18 = vmul.f32 %v1979_v17, %v1971_v57 }
 0x33b   : > { %v844_v19 = vpack.c.bf16 %v843_v18, %v843_v18 }
 0x33c   : > { %1078 = vrot.lane.b32.xlu0 %v1698_v5, %s2194_s29 }
 0x33d   : > { %1785 = vmatmul.mubr.msk.bf16.vlgmr.msra.gmra.mxu1 %vm786_vm3, %v844_v19  ;;  %v1708_v19 = vld [vmem:[%s2635_s8] ss:$0 sm:$0xff] }
 0x33e   : > { %1796 = vmatprep.mubr.msk.bf16.mxu1 %vm2193_vm0, %v2192_v0 }
 0x383   : > { %v963_v20 = vpop.permute.xlu1 %962 }
 0x384   : > { %v968_v21 = vsel %vm848_vm4, %v963_v20, 0 }
 0x385   : > { %1795 = vmatpush3.bf16.msra.mxu1 %v968_v21  ;;  %v1709_v21 = vld [vmem:[%s2677_s18] ss:$0 sm:$0xff]  ;;  %s1723_s18 = sshll.u32 %s2176_s24, 7 }
 0x386   : > { %1806 = vmatprep.subr.bf16.mxu1 %v2192_v0  ;;  %s1543_s15 = scalar_lea.hbm %s2681_s9, %s1723_s18 }
 0x387   : > { %v1195_v32 = vpop.permute.xlu1 %1194 }
 0x388   : > { %v1200_v34 = vsel %vm848_vm4, %v1195_v32, 0 }
 0x39f   : > { %v955_v22 = vpop.xlane.xlu0 %954 }
 0x3a0   : > { %1980 = vrcp.f32 %v955_v22 }
 0x3a7   : > { %v1074_v23 = vpop.xlane.xlu0 %1073 }
 0x3a8   : > { %1982 = vrcp.f32 %v1074_v23 }
 0x3ad   : > { %v1981_v24 = vpop.eup %1980 }
 0x3ae   : > { %v957_v25 = vmul.f32 %v1981_v24, %v1973_v9 }
 0x3af   : > { %v1190_v26 = vpop.xlane.xlu0 %1189 }
 0x3b0   : > { %1984 = vrcp.f32 %v1190_v26  ;;  %v958_v27 = vpack.c.bf16 %v957_v25, %v957_v25  ;;  %v1968_v25 = vld [vmem:[%s2639_s12 + $0x8] sm:$0xff]   ;;  %v1969_v26 = vld [vmem:[%s2639_s12] sm:$0xff]  }
 0x3b2   : > { %1797 = vmatmul.mubr.msk.bf16.vlgmr.msra.gmra.mxu1 %vm786_vm3, %v958_v27  ;;  %v1710_v27 = vld [vmem:[#allocation11] ss:$0 sm:$0xff] }
 0x3b3   : > { %v1079_v28 = vpop.permute.xlu0 %1078  ;;  %1808 = vmatprep.mubr.msk.bf16.mxu1 %vm2193_vm0, %v2192_v0 }
 0x3b4   : > { %v1084_v29 = vsel %vm848_vm4, %v1079_v28, 0 }
 0x3b5   : > { %v1983_v30 = vpop.eup %1982  ;;  %1807 = vmatpush3.bf16.msra.mxu1 %v1084_v29 }
 0x3b6   : > { %1818 = vmatprep.subr.bf16.mxu1 %v2192_v0  ;;  %v1076_v31 = vmul.f32 %v1983_v30, %v1975_v12  ;;  %v1964_v12 = vld [vmem:[#allocation10 + $0x8] sm:$0xff]  }
 0x3b8   : > { %v1077_v33 = vpack.c.bf16 %v1076_v31, %v1076_v31 }
 0x3ba   : > { %1809 = vmatmul.mubr.msk.bf16.vlgmr.msra.gmra.mxu1 %vm786_vm3, %v1077_v33 }
 0x3bb   : > { %1819 = vmatpush3.bf16.msra.mxu1 %v1200_v34  ;;  %1820 = vmatprep.mubr.msk.bf16.mxu1 %vm2193_vm0, %v2192_v0 }
 0x3bc   : > { %1832 = vmatprep.subr.bf16.mxu1 %v2192_v0 }
 0x3bd   : > { %v1985_v35 = vpop.eup %1984 }
 0x3be   : > { %v1192_v36 = vmul.f32 %v1985_v35, %v1977_v14  ;;  %v1967_v14 = vld [vmem:[%s2639_s12 + $0x10] sm:$0xff]   ;;  %v1714_v35 = vld [vmem:[%s2678_s16] ss:$0 sm:$0xff]  ;;  %s1531_s16 = scalar_lea.sflag [#allocation7], %s2417_s19 }
 0x3c0   : > { %v1193_v37 = vpack.c.bf16 %v1192_v36, %v1192_v36 }
 0x3c2   : > { %1821 = vmatmul.mubr.msk.bf16.vlgmr.msra.gmra.mxu1 %vm786_vm3, %v1193_v37 }
 0x3c3   : > { %1836 = vmatprep.mubr.msk.bf16.mxu1 %vm2193_vm0, %v2192_v0  ;;  %1833 = vmatpush3.bf16.msra.mxu1 %v1964_v12 }
 0x3c4   : > { %1834 = vmatprep.subr.bf16.mxu1 %v2192_v0 }
 0x3c7   : > { %1835 = vmatpush3.bf16.msra.mxu1 %v1965_v13 }
 0x3fd   : > { %v886_v38 = vpop.f32.mrf.mxu1 }
 0x3fe   : > { %892 = vst.msk [vmem:[#allocation4] sm:$0xff] %vm786_vm3, %v886_v38 }
 0x3ff   : > { %v1786_v39 = vpop.f32.mrf.mxu1 }
 0x401   : > { %v889_v40 = vpop.f32.mrf.mxu1 }
 0x403   : > { %v1787_v41 = vpop.f32.mrf.mxu1 }
 0x472   : > { %v1004_v42 = vpop.f32.mrf.mxu1 }
 0x473   : > { %1011 = vrot.lane.b32.xlu1 %v1004_v42, %s2198_s30  ;;  %s1545_s30 = sshll.u32 %s613_s17, 4  ;;  %s1546_s30 = int_to_ptr.vmem [resolvable:$true] %s1545_s30 }
 0x474   : > { %v1798_v43 = vpop.f32.mrf.mxu1  ;;  %s2096_s13 = scalar_lea.vmem %s1546_s30, 128 }
 0x475   : > { %p2097_p6 = scmp.ne.s32.totalorder %s1546_s30, %s2096_s13 }
 0x476   : > { %v1007_v44 = vpop.f32.mrf.mxu1 }
 0x477   : > { %p2098_p2 = pnand %p2097_p6, %p2387_p3 }
 0x478   : > { %v1799_v46 = vpop.f32.mrf.mxu1 }
 0x479   : > { %p2099_p11 = pneg %p2098_p2 }
 0x47a   : > { %v1120_v48 = vpop.f32.mrf.mxu1 }
 0x47b   : > { %1127 = vrot.lane.b32.xlu1 %v1120_v48, %s2199_s21 }
 0x47c   : > { %v1810_v49 = vpop.f32.mrf.mxu1 }
 0x47e   : > { %v1123_v50 = vpop.f32.mrf.mxu1 }
 0x480   : > { %v1811_v51 = vpop.f32.mrf.mxu1 }
 0x481   : > { %v1720_v51 = vld [vmem:[%s2679_s10] ss:$0 sm:$0xff]  ;;  %s2100_s10 = sshll.u32 %s2201_s6, 4  ;;  %s2101_s10 = int_to_ptr.vmem [resolvable:$false] %s2100_s10 }
 0x482   : > { %v1236_v52 = vpop.f32.mrf.mxu1  ;;  %s2102_s24 = scalar_lea.vmem %s2101_s10, 256  ;;  %p2103_p9 = scmp.lt.s32.totalorder %s1546_s30, %s2101_s10 }
 0x483   : > { %1243 = vrot.lane.b32.xlu1 %v1236_v52, %s2200_s28  ;;  %p2104_p13 = scmp.lt.s32.totalorder %s2102_s24, %s2096_s13 }
 0x484   : > { %v1822_v53 = vpop.f32.mrf.mxu1 }
 0x485   : > { %v1721_v53 = vld [vmem:[%s2680_s0] ss:$0 sm:$0xff]  ;;  %p2105_p1 = por %p2104_p13, %p2103_p9 }
 0x486   : > { %v1239_v54 = vpop.f32.mrf.mxu1 }
 0x487   : > { %p2106_p4 = pnand %p2105_p1, %p2099_p11 }
 0x488   : > { %v1823_v55 = vpop.f32.mrf.mxu1 }
 0x4e5   : > { %v1012_v56 = vpop.permute.xlu1 %1011 }
 0x4e6   : > { %1015 = vst.msk [vmem:[#allocation4] sm:$0xff] %vm1014_vm5, %v1012_v56 }
 0x4ed   : > { %v1128_v57 = vpop.permute.xlu1 %1127 }
 0x4ee   : > { %1131 = vst.msk [vmem:[#allocation4] sm:$0xff] %vm1130_vm6, %v1128_v57 }
 0x4f5   : > { %v1244_v58 = vpop.permute.xlu1 %1243 }
 0x4f6   : > { %1247 = vst.msk [vmem:[#allocation4] sm:$0xff] %vm1246_vm7, %v1244_v58 }
 0x4fd   : > { %v1248_v59 = vld [vmem:[#allocation4] sm:$0xff] }
 0x4fe   : > { %v1249_v60 = vpack.c.bf16 %v1248_v59, %v1248_v59 }
 0x500   : > { %1829 = vmatmul.mubr.msk.bf16.vlgmr.msra.gmra.mxu0 %vm643_vm1, %v1249_v60 }
 0x501   : > { %1848 = vmatprep.mubr.msk.bf16.mxu0 %vm2193_vm0, %v2192_v0 }
 0x5c0   : > { %v1310_v62 = vpop.f32.mrf.mxu0 }
 0x5c1   : > { %v1311_v63 = vadd.f32 %v1704_v61, %v1310_v62 }
 0x5c2   : > { %v1830_v1 = vpop.f32.mrf.mxu0 }
 0x5c3   : > { %v1316_v2 = vadd.f32 %v1311_v63, %v2461_v6  ;;  %v1966_v6 = vld [vmem:[%s2639_s12 + $0x18] sm:$0xff]  }
 0x5c4   : > { %v1313_v3 = vpop.f32.mrf.mxu0  ;;  %1841 = vmatpush3.bf16.msra.mxu0 %v1966_v6 }
 0x5c5   : > { %v1319_v4 = vsel %vm643_vm1, %v1316_v2, 0.0  ;;  %1842 = vmatprep.subr.bf16.mxu0 %v2192_v0 }
 0x5c6   : > { %1320 = vadd.xlane.f32.xlu1 %v1319_v4  ;;  %v1831_v5 = vpop.f32.mrf.mxu0 }
 0x5c8   : > { %1843 = vmatpush3.bf16.msra.mxu0 %v1967_v14 }
 0x5c9   : > { %1844 = vmatprep.subr.bf16.mxu0 %v2192_v0 }
 0x5cc   : > { %1845 = vmatpush3.bf16.msra.mxu0 %v1968_v25 }
 0x5cd   : > { %1846 = vmatprep.subr.bf16.mxu0 %v2192_v0 }
 0x5d0   : > { %1847 = vmatpush3.bf16.msra.mxu0 %v1969_v26 }
 0x64f   : > { %v1321_v7 = vpop.xlane.xlu1 %1320 }
 0x650   : > { %v1323_v8 = vmul.f32 0.03125, %v1321_v7 }
 0x652   : > { %v1324_v9 = vsub.f32 %v1316_v2, %v1323_v8 }
 0x654   : > { %v1325_v10 = vmul.f32 %v1324_v9, %v1324_v9 }
 0x656   : > { %v1326_v11 = vsel %vm643_vm1, %v1325_v10, 0.0 }
 0x657   : > { %1327 = vadd.xlane.f32.xlu0 %v1326_v11 }
 0x6e0   : > { %v1328_v15 = vpop.xlane.xlu0 %1327 }
 0x6e1   : > { %v1329_v16 = vmul.f32 0.03125, %v1328_v15 }
 0x6e3   : > { %v1330_v17 = vadd.f32 1e-05, %v1329_v16 }
 0x6e5   : > { %1986 = vrsqrt.f32 %v1330_v17 }
 0x6f2   : > { %v1987_v18 = vpop.eup %1986 }
 0x6f3   : > { %v1332_v20 = vmul.f32 %v1987_v18, %v1324_v9 }
 0x6f5   : > { %v1339_v22 = vmul.f32 %v1708_v19, %v1332_v20 }
 0x6f7   : > { %v1346_v23 = vadd.f32 %v1709_v21, %v1339_v22 }
 0x6f9   : > { %v1347_v24 = vpack.c.bf16 %v1346_v23, %v1346_v23 }
 0x6fb   : > { %1837 = vmatmul.mubr.msk.bf16.vlgmr.msra.gmra.mxu1 %vm643_vm1, %v1347_v24 }
 0x7bb   : > { %v1408_v28 = vpop.f32.mrf.mxu1 }
 0x7bc   : > { %v1409_v29 = vadd.f32 %v1710_v27, %v1408_v28 }
 0x7bd   : > { %v1838_v30 = vpop.f32.mrf.mxu1 }
 0x7be   : > { %v1414_v31 = vmax.f32 %v1409_v29, 0.0 }
 0x7bf   : > { %v1411_v32 = vpop.f32.mrf.mxu1 }
 0x7c0   : > { %v1415_v33 = vpack.c.bf16 %v1414_v31, %v1414_v31 }
 0x7c1   : > { %v1839_v34 = vpop.f32.mrf.mxu1 }
 0x7c2   : > { %1849 = vmatmul.mubr.msk.bf16.vlgmr.msra.gmra.mxu0 %vm1455_vm8, %v1415_v33 }
 0x882   : > { %v1493_v0 = vpop.f32.mrf.mxu0 }
 0x883   : > { %v1494_v36 = vadd.f32 %v1714_v35, %v1493_v0 }
 0x884   : > { %v1850_v37 = vpop.f32.mrf.mxu0 }
 0x885   : > { %v1499_v38 = vadd.f32 %v1494_v36, %v1346_v23 }
 0x886   : > { %v1496_v39 = vpop.f32.mrf.mxu0 }
 0x887   : > { %v1502_v40 = vsel %vm643_vm1, %v1499_v38, 0.0 }
 0x888   : > { %1503 = vadd.xlane.f32.xlu0 %v1502_v40  ;;  %v1851_v41 = vpop.f32.mrf.mxu0 }
 0x911   : > { %v1504_v42 = vpop.xlane.xlu0 %1503 }
 0x912   : > { %v1505_v43 = vmul.f32 0.03125, %v1504_v42 }
 0x914   : > { %v1506_v44 = vsub.f32 %v1499_v38, %v1505_v43 }
 0x916   : > { %v1507_v45 = vmul.f32 %v1506_v44, %v1506_v44 }
 0x918   : > { %v1508_v46 = vsel %vm643_vm1, %v1507_v45, 0.0 }
 0x919   : > { %1509 = vadd.xlane.f32.xlu1 %v1508_v46 }
 0x9a2   : > { %v1510_v47 = vpop.xlane.xlu1 %1509 }
 0x9a3   : > { %v1511_v48 = vmul.f32 0.03125, %v1510_v47 }
 0x9a5   : > { %v1512_v49 = vadd.f32 1e-05, %v1511_v48 }
 0x9a7   : > { %1988 = vrsqrt.f32 %v1512_v49 }
 0x9b4   : > { %v1989_v50 = vpop.eup %1988 }
 0x9b5   : > { %v1514_v52 = vmul.f32 %v1989_v50, %v1506_v44 }
 0x9b7   : > { %v1521_v54 = vmul.f32 %v1720_v51, %v1514_v52 }
 0x9b9   : > { %v1528_v55 = vadd.f32 %v1721_v53, %v1521_v54 }
 0x9bb   : > { %1529 = vst.msk [vmem:[%s613_s17] sm:$0xff] %vm643_vm1, %v1528_v55 }
 0x9bc   : > { %2109 = shalt.err (!%p2106_p4)
}
 0x9bd   : > { %s2110_s20 = scalar_lea.hbm %s1543_s15, 128  ;;  %s2114_s29 = scalar_lea.hbm %s2681_s9, 256 }
 0x9be   : > { %p2111_p12 = scmp.ne.s32.totalorder %s1543_s15, %s2110_s20  ;;  %p2115_p10 = scmp.lt.s32.totalorder %s1543_s15, %s2681_s9 }
 0x9bf   : > { %p2116_p7 = scmp.lt.s32.totalorder %s2114_s29, %s2110_s20 }
 0x9c0   : > { %p2112_p0 = pnand %p2111_p12, %p2387_p3 }
 0x9c1   : > { %p2117_p8 = por %p2116_p7, %p2115_p10 }
 0x9c2   : > { %p2113_p5 = pneg %p2112_p0 }
 0x9c4   : > { %p2118_p6 = pnand %p2117_p8, %p2113_p5 }
 0x9c6   : > { %2121 = shalt.err (!%p2118_p6)
}
 0x9c7   : > { %1866 = dma.vmem_to_hbm [thread:$0]  (%p2387_p3), %s1546_s30, 128, %s1543_s15, %s1531_s16  }
 0x9c8 PF: > { %s2682_s17 = sld [smem:[#allocation18_spill]]  ;;  %p2685_p11 = scmp.ge.s32.totalorder %s2184_s26, 2 }
 0x9c9   : > { %s2683_s21 = sld [smem:[#allocation19_spill]] }
 0x9ce   : > { %s1557_s28 = sand.u32 1, %s2682_s17  }
 0x9cf   : > { %p2684_p2 = scmp.ne.s32.totalorder %s2683_s21, 0  ;;  %s1558_s13 = scalar_lea.sflag [#allocation7], %s1557_s28 }
 0x9d1   : > { %p1883_p9 = pnand %p2685_p11, %p2684_p2 }
 0x9d3   : > { %p1884_p13 = pneg %p1883_p9 }
 0x9d5   : > { %2159 = dma.done.wait (%p1884_p13), %s1558_s13, 128  }
 0x9d6   : > { %2161 = vsyncadd (%p1884_p13), %s1558_s13, 4294967168  ;;  %s34_s26 = sadd.s32 1, %s2184_s26   ;;  %s2686_s27 = sld [smem:[#allocation20_spill]] }
 0x9d7   : > { %p31_p1 = scmp.ge.s32.totalorder %s34_s26, 4   ;;  %s2687_s21 = smov %s2168_s22 }
 0x9d8   : > { %s2688_s22 = smov %s2172_s23  ;;  %s2689_s23 = smov %s2399_s14 }
 0x9d9   : > { %s2690_s24 = smov %s2180_s25  ;;  %33 = sbr.rel (!%p31_p1) target bundleno = 18 (0x12), region = 148 }
 0x9dc   : > { %s2691_s25 = smov %s2686_s27 }
 0x9de   :  { %1563 = vsyncpa [#allocation6], 1 }
 0x9df   :  { %1565 = vsyncpa [#allocation6 + $0x1], 1 }
 0x9e0   :  { %1566 = vsyncpa [#allocation9], 1 }
 0x9e1   :  { %1567 = vsyncpa [#allocation12], 1 }
 0x9e2   :  { %1568 = vsyncpa [#allocation7], 1 }
 0x9e3   :  { %1570 = vsyncpa [#allocation7 + $0x1], 1 }

</bundles_post_ra>
